<compile_context>
chip_gen: v7x
topology: tpu7x:2x2x1
jax: 0.10.0
libtpu: 0.0.40
codegen_flags: <defaults>
</compile_context>

<pallas_src>
import functools
import math

import jax
import jax.numpy as jnp
from jax.experimental import pallas as pl
from jax.experimental.pallas import tpu as pltpu


def _round_up(a: int, b: int) -> int:
    return ((a + b - 1) // b) * b


def _cdiv(a: int, b: int) -> int:
    return -(-a // b)


@functools.lru_cache(maxsize=None)
def _hw_params():
    """(lane_target, vmem_capacity_bytes) for the local TPU generation."""
    vmem_cap = 64 * 2 ** 20                      # conservative (v7x per-TC) default
    try:
        vmem_cap = int(pltpu.get_tpu_info().vmem_capacity_bytes)
    except Exception:
        pass
    lane_target = 128                            # v5e and older: 4x128x128 MXU
    try:
        kind = jax.devices()[0].device_kind.lower()
        if ("v6" in kind) or ("v7" in kind):     # 2x256x256 MXU -> 256-lane pack
            lane_target = 256
    except Exception:
        pass
    return lane_target, vmem_cap


def _const_spec(shape, single_buffer):
    """BlockSpec for a grid-invariant operand; single-buffered when supported."""
    index_map = lambda i: (0,) * len(shape)
    if single_buffer and hasattr(pl, "Buffered"):
        try:
            return pl.BlockSpec(shape, index_map, pipeline_mode=pl.Buffered(1)), 1
        except TypeError:
            pass
    return pl.BlockSpec(shape, index_map), 2


def _ffenc_kernel(x_ref, w1_ref, scale_ref, shift_ref, w2_ref, o_ref):
    # Cast to the MXU operand dtype in-register (x arrives in its HBM dtype, so
    # the wrapper never materializes an extra HBM copy of x).
    x = x_ref[...].astype(w1_ref.dtype)
    h = jnp.dot(x, w1_ref[...], preferred_element_type=jnp.float32)
    # BatchNorm1d (eval): running stats + affine, applied in f32 after the
    # f32-accumulated matmul (more accurate than folding scale into bf16 W1).
    h = h * scale_ref[...] + shift_ref[...]
    # LeakyReLU(0.2); Dropout is identity in eval mode.
    h = jnp.maximum(h, 0.2 * h)
    # TODO(synk): training-mode dropout (pltpu.prng_random_bits mask) not wired in.
    o_ref[...] = jnp.dot(h.astype(w2_ref.dtype), w2_ref[...],
                         preferred_element_type=jnp.float32).astype(o_ref.dtype)


@functools.partial(
    jax.jit,
    static_argnames=("eps", "matmul_dtype", "tm_target", "out_dtype",
                     "use_single_buffer"))
def _ffenc_impl(x, w_in, w_out, gamma, beta, running_mean, running_var,
                eps, matmul_dtype, tm_target, out_dtype, use_single_buffer):
    orig_shape = x.shape
    cin = orig_shape[-1]
    hdim = w_in.shape[1]
    cout = w_out.shape[1]
    out_dt = jnp.dtype(x.dtype if out_dtype is None else out_dtype)

    x2 = x.reshape(-1, cin)                      # pure metadata reshape (no copy)
    m = x2.shape[0]

    lane_target, vmem_cap = _hw_params()
    if vmem_cap <= 96 * 2 ** 20:                 # v7x-class TC: 64 MiB VMEM
        budget, limit_cap = 36 * 2 ** 20, 48 * 2 ** 20
    else:                                        # v5e / v6e: 128 MiB physical
        budget, limit_cap = 48 * 2 ** 20, 64 * 2 ** 20

    in_bytes = jnp.dtype(matmul_dtype).itemsize
    x_bytes = jnp.dtype(x.dtype).itemsize
    out_bytes = out_dt.itemsize

    # ---- Lane-dense row packing (kron block-diagonal weights). -------------
    # Packing p rows onto the lane axis gives unmasked 128/256-wide stores, but
    # multiplies MXU work by p; only accept while the kernel stays HBM-bound.
    flops_per_byte = 512.0 if in_bytes <= 2 else 128.0   # rough MXU/HBM balance
    row_bytes = cin * x_bytes + cout * out_bytes
    base_flops = 2.0 * (cin * hdim + hdim * cout)

    def _pack_ok(p):
        if p <= 1 or m % p != 0:                 # never pad/copy x to pack
            return False
        kron_bytes = ((p * cin) * (p * hdim) + (p * hdim) * (p * cout)) * in_bytes
        if kron_bytes > 8 * 2 ** 20:
            return False
        return p * base_flops <= flops_per_byte * row_bytes

    pack = 1
    if cout % 128 != 0:
        cands = []
        for lt in (lane_target, 128):
            p = lt // math.gcd(cout, lt)
            if p not in cands:
                cands.append(p)
        for p in cands:                          # prefer the wider (256-lane) pack
            if _pack_ok(p):
                pack = p
                break
    # TODO(synk): very large Cin/H/Cout (weights that cannot stay VMEM-resident)
    # would need K/N tiling with a VMEM f32 accumulator; not implemented.

    # ---- BN fold + weight preparation (tiny wrapper-side arrays only). -----
    w1 = w_in.astype(jnp.float32)
    w2 = w_out.astype(jnp.float32)
    scale = gamma.astype(jnp.float32) * jax.lax.rsqrt(
        running_var.astype(jnp.float32) + eps)
    shift = beta.astype(jnp.float32) - running_mean.astype(jnp.float32) * scale

    if pack > 1:
        eye = jnp.eye(pack, dtype=jnp.float32)
        w1 = jnp.kron(eye, w1)                   # (pack*Cin, pack*H) block-diag
        w2 = jnp.kron(eye, w2)                   # (pack*H, pack*Cout)
        scale = jnp.tile(scale, (pack,))
        shift = jnp.tile(shift, (pack,))

    k_in, k_h, k_out = pack * cin, pack * hdim, pack * cout
    # Zero-pad hidden / output channels to lane multiples (weight-side only;
    # padding Cin would force a copy of x, so narrow x loads are accepted).
    k_h_p = _round_up(k_h, 128)
    k_out_p = _round_up(k_out, 128)
    if k_h_p != k_h:
        w1 = jnp.pad(w1, ((0, 0), (0, k_h_p - k_h)))
        scale = jnp.pad(scale, (0, k_h_p - k_h))
        shift = jnp.pad(shift, (0, k_h_p - k_h))
        w2 = jnp.pad(w2, ((0, k_h_p - k_h), (0, 0)))
    if k_out_p != k_out:
        w2 = jnp.pad(w2, ((0, 0), (0, k_out_p - k_out)))

    w1 = w1.astype(matmul_dtype)
    w2 = w2.astype(matmul_dtype)
    scale_row = scale[None, :]
    shift_row = shift[None, :]

    # x stays in HBM in its native dtype; for pack>1 the reshape below is a
    # pure row-major relabeling (no copy, no pad).
    xk = x2.reshape(m // pack, k_in) if pack > 1 else x2
    m_rows = xk.shape[0]

    # ---- Grid-invariant operand specs (single-buffered when supported). ----
    w1_spec, wbuf = _const_spec((k_in, k_h_p), use_single_buffer)
    scale_spec, _ = _const_spec((1, k_h_p), use_single_buffer)
    shift_spec, _ = _const_spec((1, k_h_p), use_single_buffer)
    w2_spec, _ = _const_spec((k_h_p, k_out_p), use_single_buffer)

    # ---- Row tiling: big tiles (>=512 sublanes), VMEM-budgeted, cdiv grid. --
    SUB = 8

    def _vmem_bytes(rb):
        return int(2 * rb * k_in * x_bytes                       # x (double buf)
                   + 2 * rb * k_out_p * out_bytes                # out (double buf)
                   + wbuf * ((k_in * k_h_p + k_h_p * k_out_p) * in_bytes
                             + 2 * k_h_p * 4)                    # weights + BN rows
                   + rb * (k_in * in_bytes + k_h_p * (4 + in_bytes)
                           + k_out_p * 4))                       # live intermediates

    rows_target = max(512, tm_target // pack)
    rows_blk = min(_round_up(rows_target, SUB), _round_up(m_rows, SUB))
    while _vmem_bytes(rows_blk) > budget and rows_blk > SUB:
        rows_blk = max(SUB, _round_up(rows_blk // 2, SUB))

    n_steps = _cdiv(m_rows, rows_blk)
    if n_steps == 1 and m_rows >= 2 * SUB:
        n_steps = 2                  # give the 2nd v7x TensorCore work
    elif n_steps > 1 and n_steps % 2 == 1:
        n_steps += 1                 # prefer an even megacore split
    rows_blk = _round_up(_cdiv(m_rows, n_steps), SUB)
    if rows_blk > m_rows:
        rows_blk = m_rows            # short input: block == full row extent
    n_steps = _cdiv(m_rows, rows_blk)

    vmem_limit = int(min(limit_cap,
                         max(16 * 2 ** 20, _vmem_bytes(rows_blk) * 5 // 4)))

    cost = pl.CostEstimate(
        flops=int(2 * m_rows * (k_in * k_h_p + k_h_p * k_out_p)),
        transcendentals=0,
        bytes_accessed=int(m_rows * k_in * x_bytes
                           + (k_in * k_h_p + k_h_p * k_out_p) * in_bytes
                           + 2 * k_h_p * 4
                           + m_rows * k_out_p * out_bytes))

    out = pl.pallas_call(
        _ffenc_kernel,
        out_shape=jax.ShapeDtypeStruct((m_rows, k_out_p), out_dt),
        grid_spec=pltpu.PrefetchScalarGridSpec(
            num_scalar_prefetch=0,
            grid=(n_steps,),
            in_specs=[
                pl.BlockSpec((rows_blk, k_in), lambda i: (i, 0)),   # x rows
                w1_spec,                                            # W1 (resident)
                scale_spec,                                         # BN scale
                shift_spec,                                         # BN shift
                w2_spec,                                            # W2 (resident)
            ],
            out_specs=pl.BlockSpec((rows_blk, k_out_p), lambda i: (i, 0)),
        ),
        compiler_params=pltpu.CompilerParams(
            dimension_semantics=("parallel",),     # row axis shards across TCs
            vmem_limit_bytes=vmem_limit),
        cost_estimate=cost,
    )(xk, w1, scale_row, shift_row, w2)

    if pack > 1:
        assert k_out_p == k_out                    # pack*Cout is 128-aligned
        out2 = out.reshape(m, cout)
    else:
        out2 = out[:, :cout] if k_out_p != cout else out
    return out2.reshape(orig_shape[:-1] + (cout,))


_SINGLE_BUFFER_OK = hasattr(pl, "Buffered")


def feed_forward_encoder(x, w_in, w_out, gamma, beta, running_mean, running_var,
                         eps: float = 1e-5, matmul_dtype=jnp.bfloat16,
                         tm_target: int = 8192, out_dtype=None):
    """FeedForwardEncoder forward (eval mode).

    x: (..., Cin); w_in: (Cin, H), w_out: (H, Cout) are the transposes of the
    PyTorch Linear weights (stored (out, in)). Returns (..., Cout) in
    `out_dtype` (defaults to x.dtype to keep the module contract).
    """
    global _SINGLE_BUFFER_OK
    args = (x, w_in, w_out, gamma, beta, running_mean, running_var)
    kw = dict(eps=eps, matmul_dtype=matmul_dtype, tm_target=tm_target,
              out_dtype=out_dtype)
    if _SINGLE_BUFFER_OK:
        try:
            return _ffenc_impl(*args, use_single_buffer=True, **kw)
        except Exception:
            _SINGLE_BUFFER_OK = False   # e.g. pl.Buffered(1) rejected by lowering
    return _ffenc_impl(*args, use_single_buffer=False, **kw)


def _reference(x, w_in, w_out, gamma, beta, running_mean, running_var, eps=1e-5):
    # The PyTorch module applies BatchNorm1d on x.transpose(1, 2), i.e. it
    # normalizes the hidden-channel (last) axis of the projected tensor.
    cout = w_out.shape[1]
    x2 = x.reshape(-1, x.shape[-1]).astype(jnp.float32)
    h = x2 @ w_in.astype(jnp.float32)
    h = (h - running_mean) / jnp.sqrt(running_var + eps) * gamma + beta
    h = jnp.where(h >= 0.0, h, 0.2 * h)
    o = h @ w_out.astype(jnp.float32)
    return o.reshape(x.shape[:-1] + (cout,))


if __name__ == "__main__":
    key = jax.random.PRNGKey(0)

    def make_params(k, cin, h, cout):
        kwi, kwo, kg, kb, km, kv = jax.random.split(k, 6)
        w_in = jax.random.normal(kwi, (cin, h), jnp.float32) * 0.1
        w_out = jax.random.normal(kwo, (h, cout), jnp.float32) * 0.1
        gamma = 1.0 + 0.1 * jax.random.normal(kg, (h,), jnp.float32)
        beta = 0.1 * jax.random.normal(kb, (h,), jnp.float32)
        mean = 0.1 * jax.random.normal(km, (h,), jnp.float32)
        var = 1.0 + 0.5 * jax.random.uniform(kv, (h,), jnp.float32)
        return w_in, w_out, gamma, beta, mean, var

    k1, k2, k3, k4 = jax.random.split(key, 4)

    # --- Case 1: small channels -> kron lane-packing path (f32 and bf16). ----
    B, S, CIN, H, COUT = 2, 8, 16, 32, 16
    x = jax.random.normal(k1, (B, S, CIN), jnp.float32)
    params = make_params(k2, CIN, H, COUT)
    ref = _reference(x, *params)

    out_f32 = jax.block_until_ready(
        feed_forward_encoder(x, *params, matmul_dtype=jnp.float32))
    assert out_f32.shape == (B, S, COUT), out_f32.shape
    assert jnp.allclose(out_f32, ref, atol=1e-2, rtol=1e-2), \
        float(jnp.max(jnp.abs(out_f32 - ref)))

    out_bf16 = jax.block_until_ready(feed_forward_encoder(x, *params))
    assert out_bf16.shape == (B, S, COUT), out_bf16.shape
    assert jnp.allclose(out_bf16, ref, atol=5e-2, rtol=5e-2), \
        float(jnp.max(jnp.abs(out_bf16 - ref)))

    # --- Case 2: packing rejected -> pack=1, lane-padded W2, partial tail. ---
    B2, S2, CIN2, H2, COUT2 = 2, 9, 24, 512, 24
    xb = jax.random.normal(k3, (B2, S2, CIN2), jnp.float32)
    params2 = make_params(k4, CIN2, H2, COUT2)
    ref2 = _reference(xb, *params2)
    out2 = jax.block_until_ready(feed_forward_encoder(xb, *params2))
    assert out2.shape == (B2, S2, COUT2), out2.shape
    assert jnp.allclose(out2, ref2, atol=5e-2, rtol=5e-2), \
        float(jnp.max(jnp.abs(out2 - ref2)))

    print("KERNEL_OK")
</pallas_src>

<mosaic_0001>
module attributes {stable_mosaic.version = 11 : i64} {
  func.func @_ffenc_kernel(%arg0: i32, %arg1: memref<2x128xf32, #tpu.memory_space<vmem>>, %arg2: memref<128x256xf32, #tpu.memory_space<vmem>>, %arg3: memref<1x256xf32, #tpu.memory_space<vmem>>, %arg4: memref<1x256xf32, #tpu.memory_space<vmem>>, %arg5: memref<256x128xf32, #tpu.memory_space<vmem>>, %arg6: memref<2x128xf32, #tpu.memory_space<vmem>>) attributes {dimension_semantics = [#tpu.dimension_semantics<parallel>], iteration_bounds = array<i64: 1>, scalar_prefetch = 0 : i64, scratch_operands = 0 : i64, tpu.core_type = #tpu.core_type<tc>, window_params = [{transform_indices = @transform_0, window_bounds = array<i64: 2, 128>}, {pipeline_mode = #tpu.pipeline_mode<synchronous>, transform_indices = @transform_1, window_bounds = array<i64: 128, 256>}, {pipeline_mode = #tpu.pipeline_mode<synchronous>, transform_indices = @transform_2, window_bounds = array<i64: 1, 256>}, {pipeline_mode = #tpu.pipeline_mode<synchronous>, transform_indices = @transform_3, window_bounds = array<i64: 1, 256>}, {pipeline_mode = #tpu.pipeline_mode<synchronous>, transform_indices = @transform_4, window_bounds = array<i64: 256, 128>}, {transform_indices = @transform_5, window_bounds = array<i64: 2, 128>}]} {
    %c0 = arith.constant 0 : index
    %c0_0 = arith.constant 0 : index
    %0 = vector.load %arg1[%c0, %c0_0] : memref<2x128xf32, #tpu.memory_space<vmem>>, vector<2x128xf32>
    %c0_1 = arith.constant 0 : index
    %c0_2 = arith.constant 0 : index
    %1 = vector.load %arg2[%c0_1, %c0_2] : memref<128x256xf32, #tpu.memory_space<vmem>>, vector<128x256xf32>
    %cst = arith.constant dense<0.000000e+00> : vector<2x256xf32>
    %2 = tpu.matmul %0, %1, %cst {dimension_numbers = #tpu.dot_dimension_numbers<[1], [0], [0], [1], [0, 0, 1, 1], [], []>} : vector<2x128xf32>, vector<128x256xf32>, vector<2x256xf32> -> vector<2x256xf32>
    %c0_3 = arith.constant 0 : index
    %c0_4 = arith.constant 0 : index
    %3 = vector.load %arg3[%c0_3, %c0_4] : memref<1x256xf32, #tpu.memory_space<vmem>>, vector<1x256xf32>
    %4 = vector.broadcast %3 : vector<1x256xf32> to vector<2x256xf32>
    %5 = arith.mulf %2, %4 : vector<2x256xf32>
    %c0_5 = arith.constant 0 : index
    %c0_6 = arith.constant 0 : index
    %6 = vector.load %arg4[%c0_5, %c0_6] : memref<1x256xf32, #tpu.memory_space<vmem>>, vector<1x256xf32>
    %7 = vector.broadcast %6 : vector<1x256xf32> to vector<2x256xf32>
    %8 = arith.addf %5, %7 : vector<2x256xf32>
    %cst_7 = arith.constant 2.000000e-01 : f32
    %9 = vector.broadcast %cst_7 : f32 to vector<2x256xf32>
    %10 = arith.mulf %9, %8 : vector<2x256xf32>
    %11 = arith.maximumf %8, %10 : vector<2x256xf32>
    %c0_8 = arith.constant 0 : index
    %c0_9 = arith.constant 0 : index
    %12 = vector.load %arg5[%c0_8, %c0_9] : memref<256x128xf32, #tpu.memory_space<vmem>>, vector<256x128xf32>
    %cst_10 = arith.constant dense<0.000000e+00> : vector<2x128xf32>
    %13 = tpu.matmul %11, %12, %cst_10 {dimension_numbers = #tpu.dot_dimension_numbers<[1], [0], [0], [1], [0, 0, 1, 1], [], []>} : vector<2x256xf32>, vector<256x128xf32>, vector<2x128xf32> -> vector<2x128xf32>
    %c0_11 = arith.constant 0 : index
    %c0_12 = arith.constant 0 : index
    %14 = vector.load %arg6[%c0_11, %c0_12] : memref<2x128xf32, #tpu.memory_space<vmem>>, vector<2x128xf32>
    tpu.vector_store %arg6[%c0_11, %c0_12], %13 {strides = array<i32>} : memref<2x128xf32, #tpu.memory_space<vmem>>, vector<2x128xf32>,
    return
  }
  func.func @transform_0(%arg0: i32) -> (i32, i32) {
    %c0_i32 = arith.constant 0 : i32
    %c0_i32_0 = arith.constant 0 : i32
    return %arg0, %c0_i32 : i32, i32
  }
  func.func @transform_1(%arg0: i32) -> (i32, i32) {
    %c0_i32 = arith.constant 0 : i32
    %c0_i32_0 = arith.constant 0 : i32
    %c0_i32_1 = arith.constant 0 : i32
    return %c0_i32, %c0_i32_0 : i32, i32
  }
  func.func @transform_2(%arg0: i32) -> (i32, i32) {
    %c0_i32 = arith.constant 0 : i32
    %c0_i32_0 = arith.constant 0 : i32
    %c0_i32_1 = arith.constant 0 : i32
    return %c0_i32, %c0_i32_0 : i32, i32
  }
  func.func @transform_3(%arg0: i32) -> (i32, i32) {
    %c0_i32 = arith.constant 0 : i32
    %c0_i32_0 = arith.constant 0 : i32
    %c0_i32_1 = arith.constant 0 : i32
    return %c0_i32, %c0_i32_0 : i32, i32
  }
  func.func @transform_4(%arg0: i32) -> (i32, i32) {
    %c0_i32 = arith.constant 0 : i32
    %c0_i32_0 = arith.constant 0 : i32
    %c0_i32_1 = arith.constant 0 : i32
    return %c0_i32, %c0_i32_0 : i32, i32
  }
  func.func @transform_5(%arg0: i32) -> (i32, i32) {
    %c0_i32 = arith.constant 0 : i32
    %c0_i32_0 = arith.constant 0 : i32
    return %arg0, %c0_i32 : i32, i32
  }
}

module attributes {stable_mosaic.version = 11 : i64} {
  func.func @_ffenc_kernel(%arg0: i32, %arg1: memref<2x128xf32, #tpu.memory_space<vmem>>, %arg2: memref<128x256xf32, #tpu.memory_space<vmem>>, %arg3: memref<1x256xf32, #tpu.memory_space<vmem>>, %arg4: memref<1x256xf32, #tpu.memory_space<vmem>>, %arg5: memref<256x128xf32, #tpu.memory_space<vmem>>, %arg6: memref<2x128xf32, #tpu.memory_space<vmem>>) attributes {dimension_semantics = [#tpu.dimension_semantics<parallel>], iteration_bounds = array<i64: 1>, scalar_prefetch = 0 : i64, scratch_operands = 0 : i64, tpu.core_type = #tpu.core_type<tc>, window_params = [{transform_indices = @transform_0, window_bounds = array<i64: 2, 128>}, {pipeline_mode = #tpu.pipeline_mode<synchronous>, transform_indices = @transform_1, window_bounds = array<i64: 128, 256>}, {pipeline_mode = #tpu.pipeline_mode<synchronous>, transform_indices = @transform_2, window_bounds = array<i64: 1, 256>}, {pipeline_mode = #tpu.pipeline_mode<synchronous>, transform_indices = @transform_3, window_bounds = array<i64: 1, 256>}, {pipeline_mode = #tpu.pipeline_mode<synchronous>, transform_indices = @transform_4, window_bounds = array<i64: 256, 128>}, {transform_indices = @transform_5, window_bounds = array<i64: 2, 128>}]} {
    %c0 = arith.constant 0 : index
    %c0_0 = arith.constant 0 : index
    %0 = vector.load %arg1[%c0, %c0_0] : memref<2x128xf32, #tpu.memory_space<vmem>>, vector<2x128xf32>
    %c0_1 = arith.constant 0 : index
    %c0_2 = arith.constant 0 : index
    %1 = vector.load %arg2[%c0_1, %c0_2] : memref<128x256xf32, #tpu.memory_space<vmem>>, vector<128x256xf32>
    %cst = arith.constant dense<0.000000e+00> : vector<2x256xf32>
    %2 = tpu.matmul %0, %1, %cst {dimension_numbers = #tpu.dot_dimension_numbers<[1], [0], [0], [1], [0, 0, 1, 1], [], []>} : vector<2x128xf32>, vector<128x256xf32>, vector<2x256xf32> -> vector<2x256xf32>
    %c0_3 = arith.constant 0 : index
    %c0_4 = arith.constant 0 : index
    %3 = vector.load %arg3[%c0_3, %c0_4] : memref<1x256xf32, #tpu.memory_space<vmem>>, vector<1x256xf32>
    %4 = vector.broadcast %3 : vector<1x256xf32> to vector<2x256xf32>
    %5 = arith.mulf %2, %4 : vector<2x256xf32>
    %c0_5 = arith.constant 0 : index
    %c0_6 = arith.constant 0 : index
    %6 = vector.load %arg4[%c0_5, %c0_6] : memref<1x256xf32, #tpu.memory_space<vmem>>, vector<1x256xf32>
    %7 = vector.broadcast %6 : vector<1x256xf32> to vector<2x256xf32>
    %8 = arith.addf %5, %7 : vector<2x256xf32>
    %cst_7 = arith.constant 2.000000e-01 : f32
    %9 = vector.broadcast %cst_7 : f32 to vector<2x256xf32>
    %10 = arith.mulf %9, %8 : vector<2x256xf32>
    %11 = arith.maximumf %8, %10 : vector<2x256xf32>
    %c0_8 = arith.constant 0 : index
    %c0_9 = arith.constant 0 : index
    %12 = vector.load %arg5[%c0_8, %c0_9] : memref<256x128xf32, #tpu.memory_space<vmem>>, vector<256x128xf32>
    %cst_10 = arith.constant dense<0.000000e+00> : vector<2x128xf32>
    %13 = tpu.matmul %11, %12, %cst_10 {dimension_numbers = #tpu.dot_dimension_numbers<[1], [0], [0], [1], [0, 0, 1, 1], [], []>} : vector<2x256xf32>, vector<256x128xf32>, vector<2x128xf32> -> vector<2x128xf32>
    %c0_11 = arith.constant 0 : index
    %c0_12 = arith.constant 0 : index
    %14 = vector.load %arg6[%c0_11, %c0_12] : memref<2x128xf32, #tpu.memory_space<vmem>>, vector<2x128xf32>
    tpu.vector_store %arg6[%c0_11, %c0_12], %13 {strides = array<i32>} : memref<2x128xf32, #tpu.memory_space<vmem>>, vector<2x128xf32>,
    return
  }
  func.func @transform_0(%arg0: i32) -> (i32, i32) {
    %c0_i32 = arith.constant 0 : i32
    %c0_i32_0 = arith.constant 0 : i32
    return %arg0, %c0_i32 : i32, i32
  }
  func.func @transform_1(%arg0: i32) -> (i32, i32) {
    %c0_i32 = arith.constant 0 : i32
    %c0_i32_0 = arith.constant 0 : i32
    %c0_i32_1 = arith.constant 0 : i32
    return %c0_i32, %c0_i32_0 : i32, i32
  }
  func.func @transform_2(%arg0: i32) -> (i32, i32) {
    %c0_i32 = arith.constant 0 : i32
    %c0_i32_0 = arith.constant 0 : i32
    %c0_i32_1 = arith.constant 0 : i32
    return %c0_i32, %c0_i32_0 : i32, i32
  }
  func.func @transform_3(%arg0: i32) -> (i32, i32) {
    %c0_i32 = arith.constant 0 : i32
    %c0_i32_0 = arith.constant 0 : i32
    %c0_i32_1 = arith.constant 0 : i32
    return %c0_i32, %c0_i32_0 : i32, i32
  }
  func.func @transform_4(%arg0: i32) -> (i32, i32) {
    %c0_i32 = arith.constant 0 : i32
    %c0_i32_0 = arith.constant 0 : i32
    %c0_i32_1 = arith.constant 0 : i32
    return %c0_i32, %c0_i32_0 : i32, i32
  }
  func.func @transform_5(%arg0: i32) -> (i32, i32) {
    %c0_i32 = arith.constant 0 : i32
    %c0_i32_0 = arith.constant 0 : i32
    return %arg0, %c0_i32 : i32, i32
  }
}

</mosaic_0001>

<bundles_post_ra>
// kernel: tile.13
= control target key start
LH: loop header
LB: loop body
LE: loop exit
PB: predicated region body
PF: predicated region fallthrough
CT: control target
= control target key end

     0   :  { %s22_s0 = inlined_call_operand.vmem [shape: f32[32], index: 0, kind: input, shape index: {}]   ;;  %s23_s1 = inlined_call_operand.vmem [shape: f32[8,32], index: 1, kind: output, shape index: {}]  }
   0x1   :  { %v4_v0 = vld [vmem:[%s22_s0] ss:$0 sm:$0xff] }
   0x2   :  { %5 = vst [vmem:[%s23_s1] sm:$0xff] %v4_v0 }

// kernel: tile.18
= control target key start
LH: loop header
LB: loop body
LE: loop exit
PB: predicated region body
PF: predicated region fallthrough
CT: control target
= control target key end

     0   :  { %s7_s6 = smov 3  ;;  %s14_s9 = smov 3  ;;  %vm4_vm0 = vcmask 261120   ;;  %vm11_vm1 = vcmask 1048320   ;;  %vm18_vm2 = vcmask 785920   ;;  %vm25_vm3 = vcmask 523520   ;;  %s76_s0 = inlined_call_operand.vmem [shape: f32[8,32], index: 0, kind: input, shape index: {}]   ;;  %s77_s1 = inlined_call_operand.vmem [shape: f32[1,256], index: 1, kind: output, shape index: {}]  }
   0x1   :  { %v38_v0 = vld [vmem:[%s76_s0 + $0x3] ss:$4 sm:%s7_s6]   ;;  %s45_s10 = smov 96   ;;  %s21_s11 = smov 3  ;;  %v39_v1 = vld [vmem:[%s76_s0 + $0x2] ss:$4 sm:%s14_s9]  }
   0x2   :  { %9 = vrot.lane.b32.xlu0 %v38_v0, %s45_s10  ;;  %v40_v2 = vld [vmem:[%s76_s0 + $0x1] ss:$4 sm:%s21_s11]   ;;  %s2_s16 = smov 3  ;;  %s46_s17 = smov 32  }
   0x3   :  { %23 = vrot.lane.b32.xlu1 %v40_v2, %s46_s17  ;;  %v3_v3 = vld [vmem:[%s76_s0] ss:$4 sm:%s2_s16]   ;;  %s47_s0 = smov 64  }
   0x4   :  { %5 = vst.msk [vmem:[#allocation0] ss:$8 sm:$0x3] %vm4_vm0, %v3_v3  }
   0x6   :  { %16 = vrot.lane.b32.xlu0 %v39_v1, %s47_s0 }
  0x74   :  { %v10_v4 = vpop.permute.xlu0 %9  }
  0x75   :  { %12 = vst.msk [vmem:[#allocation0] ss:$8 sm:$0x3] %vm11_vm1, %v10_v4   ;;  %v24_v5 = vpop.permute.xlu1 %23  }
  0x78   :  { %v17_v6 = vpop.permute.xlu0 %16  }
  0x79   :  { %19 = vst.msk [vmem:[#allocation0] ss:$8 sm:$0x3] %vm18_vm2, %v17_v6  }
  0x7a   :  { %26 = vst.msk [vmem:[#allocation0] ss:$8 sm:$0x3] %vm25_vm3, %v24_v5  }
  0x81   :  { %v30_v7 = vld [vmem:[#allocation0] sm:$0x1]  ;;  %v34_v8 = vld [vmem:[#allocation0 + $0x8] sm:$0x1] }
  0x82   :  { %32 = vst [vmem:[%s77_s1] sm:$0x1] %v30_v7  ;;  %41 = vst [vmem:[%s77_s1 + $0x1] sm:$0x1] %v34_v8 }

// kernel: _ffenc_impl.1
= control target key start
LH: loop header
LB: loop body
LE: loop exit
PB: predicated region body
PF: predicated region fallthrough
CT: control target
= control target key end

     0   :  { %v363_v3 = vmov 0.0   ;;  %s598_s1 = inlined_call_operand.vmem [shape: f32[128,256], index: 1, kind: input, shape index: {}]   ;;  %s599_s4 = inlined_call_operand.vmem [shape: f32[256,128], index: 4, kind: input, shape index: {}]   ;;  %s600_s0 = inlined_call_operand.vmem [shape: f32[2,128], index: 0, kind: input, shape index: {}]   ;;  %s601_s2 = inlined_call_operand.vmem [shape: f32[1,256], index: 2, kind: input, shape index: {}]   ;;  %s602_s3 = inlined_call_operand.vmem [shape: f32[1,256], index: 3, kind: input, shape index: {}]   ;;  %s603_s5 = inlined_call_operand.vmem [shape: f32[2,128], index: 5, kind: output, shape index: {}]  }
   0x1   :  { %v22_v0 = vld [vmem:[%s598_s1 + $0x8] sm:$0xff]  ;;  %v24_v1 = vld [vmem:[%s598_s1 + $0x18] sm:$0xff]  ;;  %v21_v2 = vld [vmem:[%s598_s1] sm:$0xff]  ;;  %117 = vmatprep.mubr.f32.mxu0 %v363_v3 }
   0x2   :  { %v298_v4 = vpack.c.bf16 %v24_v1, %v22_v0  ;;  %v23_v5 = vld [vmem:[%s598_s1 + $0x10] sm:$0xff]  ;;  %v26_v6 = vld [vmem:[%s598_s1 + $0x28] sm:$0xff]  ;;  %v28_v7 = vld [vmem:[%s598_s1 + $0x38] sm:$0xff] }
   0x3   :  { %v300_v8 = vpack.c.bf16 %v23_v5, %v21_v2  ;;  %v302_v9 = vpack.c.bf16 %v28_v7, %v26_v6  ;;  %v25_v10 = vld [vmem:[%s598_s1 + $0x20] sm:$0xff]  ;;  %v27_v11 = vld [vmem:[%s598_s1 + $0x30] sm:$0xff]  ;;  %v30_v12 = vld [vmem:[%s598_s1 + $0x48] sm:$0xff] }
   0x4   :  { %299 = vmatprep.subr.bf16.mxu0 %v298_v4  ;;  %v32_v13 = vld [vmem:[%s598_s1 + $0x58] sm:$0xff]  ;;  %v304_v14 = vpack.c.bf16 %v27_v11, %v25_v10  ;;  %v29_v16 = vld [vmem:[%s598_s1 + $0x40] sm:$0xff]  ;;  %v31_v17 = vld [vmem:[%s598_s1 + $0x50] sm:$0xff] }
   0x5   :  { %301 = vmatpush1.bf16.msra.mxu0 %v300_v8  ;;  %v306_v15 = vpack.c.bf16 %v32_v13, %v30_v12  ;;  %v34_v18 = vld [vmem:[%s598_s1 + $0x68] sm:$0xff]  ;;  %v36_v19 = vld [vmem:[%s598_s1 + $0x78] sm:$0xff]  ;;  %v308_v20 = vpack.c.bf16 %v31_v17, %v29_v16  ;;  %v33_v22 = vld [vmem:[%s598_s1 + $0x60] sm:$0xff] }
   0x6   :  { %303 = vmatprep.subr.bf16.mxu0 %v302_v9  ;;  %v310_v21 = vpack.c.bf16 %v36_v19, %v34_v18  ;;  %v35_v23 = vld [vmem:[%s598_s1 + $0x70] sm:$0xff]  ;;  %v38_v24 = vld [vmem:[%s598_s1 + $0x88] sm:$0xff]  ;;  %v40_v25 = vld [vmem:[%s598_s1 + $0x98] sm:$0xff] }
   0x7   :  { %v37_v26 = vld [vmem:[%s598_s1 + $0x80] sm:$0xff]  ;;  %v39_v27 = vld [vmem:[%s598_s1 + $0x90] sm:$0xff]  ;;  %v173_v29 = vld [vmem:[%s599_s4 + $0x88] sm:$0xff]  ;;  %v312_v31 = vpack.c.bf16 %v35_v23, %v33_v22  ;;  %v314_v36 = vpack.c.bf16 %v40_v25, %v38_v24 }
   0x8   :  { %v172_v28 = vld [vmem:[%s599_s4 + $0x80] sm:$0xff]  ;;  %v157_v33 = vld [vmem:[%s599_s4 + $0x8] sm:$0xff]  ;;  %v174_v34 = vld [vmem:[%s599_s4 + $0x90] sm:$0xff]  ;;  %v316_v46 = vpack.c.bf16 %v39_v27, %v37_v26 }
   0x9   :  { %305 = vmatpush1.bf16.msra.mxu0 %v304_v14  ;;  %v156_v30 = vld [vmem:[%s599_s4] sm:$0xff]  ;;  %v330_v32 = vpack.c.bf16 %v173_v29, %v172_v28  ;;  %v175_v35 = vld [vmem:[%s599_s4 + $0x98] sm:$0xff]  ;;  %v158_v39 = vld [vmem:[%s599_s4 + $0x10] sm:$0xff] }
   0xa   :  { %307 = vmatprep.subr.bf16.mxu0 %v306_v15  ;;  %v332_v37 = vpack.c.bf16 %v157_v33, %v156_v30  ;;  %v334_v38 = vpack.c.bf16 %v175_v35, %v174_v34  ;;  %v159_v40 = vld [vmem:[%s599_s4 + $0x18] sm:$0xff]  ;;  %v176_v41 = vld [vmem:[%s599_s4 + $0xa0] sm:$0xff]  ;;  %v42_v42 = vld [vmem:[%s598_s1 + $0xa8] sm:$0xff]  ;;  %v126_v34 = vlaneseq }
   0xb   :  { %v44_v43 = vld [vmem:[%s598_s1 + $0xb8] sm:$0xff]  ;;  %331 = vmatprep.subr.bf16.mxu1 %v330_v32  ;;  %v177_v44 = vld [vmem:[%s599_s4 + $0xa8] sm:$0xff]  ;;  %v336_v45 = vpack.c.bf16 %v159_v40, %v158_v39  ;;  %v41_v47 = vld [vmem:[%s598_s1 + $0xa0] sm:$0xff] }
   0xc   :  { %333 = vmatpush3.bf16.msra.mxu1 %v332_v37  ;;  %v338_v48 = vpack.c.bf16 %v177_v44, %v176_v41  ;;  %v160_v49 = vld [vmem:[%s599_s4 + $0x20] sm:$0xff]  ;;  %v161_v50 = vld [vmem:[%s599_s4 + $0x28] sm:$0xff]  ;;  %v318_v51 = vpack.c.bf16 %v44_v43, %v42_v42  ;;  %v43_v52 = vld [vmem:[%s598_s1 + $0xb0] sm:$0xff]  ;;  %v127_v35 = vshrl.u32 %v126_v34, 7 }
   0xd   :  { %309 = vmatpush1.bf16.msra.mxu0 %v308_v20  ;;  %335 = vmatprep.subr.bf16.mxu1 %v334_v38  ;;  %v178_v53 = vld [vmem:[%s599_s4 + $0xb0] sm:$0xff]  ;;  %v179_v54 = vld [vmem:[%s599_s4 + $0xb8] sm:$0xff]  ;;  %v46_v55 = vld [vmem:[%s598_s1 + $0xc8] sm:$0xff]  ;;  %v340_v57 = vpack.c.bf16 %v161_v50, %v160_v49  ;;  %v320_v58 = vpack.c.bf16 %v43_v52, %v41_v47 }
   0xe   :  { %311 = vmatprep.subr.bf16.mxu0 %v310_v21  ;;  %v48_v56 = vld [vmem:[%s598_s1 + $0xd8] sm:$0xff]  ;;  %v45_v59 = vld [vmem:[%s598_s1 + $0xc0] sm:$0xff]  ;;  %v342_v60 = vpack.c.bf16 %v179_v54, %v178_v53  ;;  %v162_v61 = vld [vmem:[%s599_s4 + $0x30] sm:$0xff]  ;;  %v132_v38 = vsub.s32 1, %v127_v35 }
   0xf   :  { %v163_v62 = vld [vmem:[%s599_s4 + $0x38] sm:$0xff]  ;;  %v322_v63 = vpack.c.bf16 %v48_v56, %v46_v55  ;;  %v47_v0 = vld [vmem:[%s598_s1 + $0xd0] sm:$0xff]  ;;  %v180_v1 = vld [vmem:[%s599_s4 + $0xc0] sm:$0xff] }
  0x10   :  { %337 = vmatpush3.bf16.msra.mxu1 %v336_v45  ;;  %v181_v2 = vld [vmem:[%s599_s4 + $0xc8] sm:$0xff]  ;;  %v52_v4 = vld [vmem:[%s598_s1 + $0xf8] sm:$0xff]  ;;  %v344_v5 = vpack.c.bf16 %v163_v62, %v162_v61  ;;  %v324_v6 = vpack.c.bf16 %v47_v0, %v45_v59  ;;  %v49_v7 = vld [vmem:[%s598_s1 + $0xe0] sm:$0xff] }
  0x11   :  { %313 = vmatpush1.bf16.msra.mxu0 %v312_v31  ;;  %339 = vmatprep.subr.bf16.mxu1 %v338_v48  ;;  %v50_v3 = vld [vmem:[%s598_s1 + $0xe8] sm:$0xff]  ;;  %v346_v8 = vpack.c.bf16 %v181_v2, %v180_v1  ;;  %v164_v9 = vld [vmem:[%s599_s4 + $0x40] sm:$0xff]  ;;  %v51_v12 = vld [vmem:[%s598_s1 + $0xf0] sm:$0xff] }
  0x12   :  { %315 = vmatprep.subr.bf16.mxu0 %v314_v36  ;;  %v165_v10 = vld [vmem:[%s599_s4 + $0x48] sm:$0xff]  ;;  %v326_v11 = vpack.c.bf16 %v52_v4, %v50_v3  ;;  %v182_v13 = vld [vmem:[%s599_s4 + $0xd0] sm:$0xff]  ;;  %v183_v14 = vld [vmem:[%s599_s4 + $0xd8] sm:$0xff]  ;;  %v328_v16 = vpack.c.bf16 %v51_v12, %v49_v7  ;;  %v128_v36 = vsub.s32 0, %v127_v35 }
  0x13   :  { %v348_v15 = vpack.c.bf16 %v165_v10, %v164_v9  ;;  %v350_v17 = vpack.c.bf16 %v183_v14, %v182_v13  ;;  %v20_v18 = vld [vmem:[%s600_s0] sm:$0x3]  ;;  %v166_v19 = vld [vmem:[%s599_s4 + $0x50] sm:$0xff]  ;;  %v167_v20 = vld [vmem:[%s599_s4 + $0x58] sm:$0xff] }
  0x14   :  { %341 = vmatpush3.bf16.msra.mxu1 %v340_v57  ;;  %v352_v21 = vpack.c.bf16 %v167_v20, %v166_v19  ;;  %v184_v22 = vld [vmem:[%s599_s4 + $0xe0] sm:$0xff]  ;;  %v185_v23 = vld [vmem:[%s599_s4 + $0xe8] sm:$0xff]  ;;  %v186_v28 = vld [vmem:[%s599_s4 + $0xf0] sm:$0xff] }
  0x15   :  { %317 = vmatpush1.bf16.msra.mxu0 %v316_v46  ;;  %343 = vmatprep.subr.bf16.mxu1 %v342_v60  ;;  %v354_v24 = vpack.c.bf16 %v185_v23, %v184_v22  ;;  %v168_v25 = vld [vmem:[%s599_s4 + $0x60] sm:$0xff]  ;;  %v169_v26 = vld [vmem:[%s599_s4 + $0x68] sm:$0xff]  ;;  %v187_v29 = vld [vmem:[%s599_s4 + $0xf8] sm:$0xff] }
  0x16   :  { %319 = vmatprep.subr.bf16.mxu0 %v318_v51  ;;  %v356_v27 = vpack.c.bf16 %v169_v26, %v168_v25  ;;  %v358_v30 = vpack.c.bf16 %v187_v29, %v186_v28  ;;  %v170_v31 = vld [vmem:[%s599_s4 + $0x70] sm:$0xff]  ;;  %v171_v32 = vld [vmem:[%s599_s4 + $0x78] sm:$0xff]  ;;  %v124_v37 = vld [vmem:[%s601_s2] sm:$0x3] }
  0x17   :  { %v360_v33 = vpack.c.bf16 %v171_v32, %v170_v31  ;;  %v138_v39 = vld [vmem:[%s602_s3] sm:$0x3]  ;;  %v129_v40 = vrot.slane %v124_v37, %v128_v36  ;;  %v133_v41 = vrot.slane %v124_v37, %v132_v38 }
  0x18   :  { %345 = vmatpush3.bf16.msra.mxu1 %v344_v5  ;;  %v143_v42 = vrot.slane %v138_v39, %v128_v36  ;;  %v147_v44 = vrot.slane %v138_v39, %v132_v38 }
  0x19   :  { %321 = vmatpush1.bf16.msra.mxu0 %v320_v58  ;;  %347 = vmatprep.subr.bf16.mxu1 %v346_v8 }
  0x1a   :  { %323 = vmatprep.subr.bf16.mxu0 %v322_v63 }
  0x1c   :  { %349 = vmatpush3.bf16.msra.mxu1 %v348_v15 }
  0x1d   :  { %325 = vmatpush1.bf16.msra.mxu0 %v324_v6  ;;  %351 = vmatprep.subr.bf16.mxu1 %v350_v17 }
  0x1e   :  { %327 = vmatprep.subr.bf16.mxu0 %v326_v11 }
  0x20   :  { %353 = vmatpush3.bf16.msra.mxu1 %v352_v21 }
  0x21   :  { %329 = vmatpush1.bf16.msra.mxu0 %v328_v16  ;;  %355 = vmatprep.subr.bf16.mxu1 %v354_v24 }
  0x24   :  { %118 = vmatmul.mubr.f32.vlgmr.msra.gmra.mrb[0].mxu0 %v20_v18  ;;  %357 = vmatpush3.bf16.msra.mxu1 %v356_v27 }
  0x25   :  { %359 = vmatprep.subr.bf16.mxu1 %v358_v30 }
  0x28   :  { %361 = vmatpush3.bf16.msra.mxu1 %v360_v33 }
  0xf7   :  { %v119_v43 = vpop.f32.mrb[0].mxu0 }
  0xf8   :  { %v136_v45 = vmul.f32 %v129_v40, %v119_v43  ;;  %v121_v46 = vpop.f32.mrb[1].mxu0 }
  0xf9   :  { %v137_v47 = vmul.f32 %v133_v41, %v121_v46 }
  0xfa   :  { %v150_v48 = vadd.f32 %v143_v42, %v136_v45 }
  0xfb   :  { %v151_v49 = vadd.f32 %v147_v44, %v137_v47 }
  0xfc   :  { %v152_v50 = vmul.f32 0.2, %v150_v48 }
  0xfd   :  { %v153_v51 = vmul.f32 0.2, %v151_v49 }
  0xfe   :  { %v154_v53 = vmax.f32 %v150_v48, %v152_v50 }
  0xff   :  { %v155_v52 = vmax.f32 %v151_v49, %v153_v51 }
 0x101   :  { %252 = vmatprep.mubr.f32.mxu1 %v155_v52 }
 0x102   :  { %253 = vmatmul.mubr.f32.vlgmr.msra.gmra.mrb[0].mxu1 %v154_v53 }
 0x1d5   :  { %v295_v54 = vpop.f32.mrb[0].mxu1 }
 0x1d6   :  { %v296_v55 = vpop.f32.mrb[1].mxu1 }
 0x1d7   :  { %v297_v56 = vadd.f32 %v296_v55, %v295_v54 }
 0x1d9   :  { %258 = vst [vmem:[%s603_s5] sm:$0x3] %v297_v56 }

// kernel: tile.13
= control target key start
LH: loop header
LB: loop body
LE: loop exit
PB: predicated region body
PF: predicated region fallthrough
CT: control target
= control target key end

     0   :  { %s22_s0 = inlined_call_operand.vmem [shape: f32[32], index: 0, kind: input, shape index: {}]   ;;  %s23_s1 = inlined_call_operand.vmem [shape: f32[8,32], index: 1, kind: output, shape index: {}]  }
   0x1   :  { %v4_v0 = vld [vmem:[%s22_s0] ss:$0 sm:$0xff] }
   0x2   :  { %5 = vst [vmem:[%s23_s1] sm:$0xff] %v4_v0 }

// kernel: tile.18
= control target key start
LH: loop header
LB: loop body
LE: loop exit
PB: predicated region body
PF: predicated region fallthrough
CT: control target
= control target key end

     0   :  { %s7_s6 = smov 3  ;;  %s14_s9 = smov 3  ;;  %vm4_vm0 = vcmask 261120   ;;  %vm11_vm1 = vcmask 1048320   ;;  %vm18_vm2 = vcmask 785920   ;;  %vm25_vm3 = vcmask 523520   ;;  %s76_s0 = inlined_call_operand.vmem [shape: f32[8,32], index: 0, kind: input, shape index: {}]   ;;  %s77_s1 = inlined_call_operand.vmem [shape: f32[1,256], index: 1, kind: output, shape index: {}]  }
   0x1   :  { %v38_v0 = vld [vmem:[%s76_s0 + $0x3] ss:$4 sm:%s7_s6]   ;;  %s45_s10 = smov 96   ;;  %s21_s11 = smov 3  ;;  %v39_v1 = vld [vmem:[%s76_s0 + $0x2] ss:$4 sm:%s14_s9]  }
   0x2   :  { %9 = vrot.lane.b32.xlu0 %v38_v0, %s45_s10  ;;  %v40_v2 = vld [vmem:[%s76_s0 + $0x1] ss:$4 sm:%s21_s11]   ;;  %s2_s16 = smov 3  ;;  %s46_s17 = smov 32  }
   0x3   :  { %23 = vrot.lane.b32.xlu1 %v40_v2, %s46_s17  ;;  %v3_v3 = vld [vmem:[%s76_s0] ss:$4 sm:%s2_s16]   ;;  %s47_s0 = smov 64  }
   0x4   :  { %5 = vst.msk [vmem:[#allocation0] ss:$8 sm:$0x3] %vm4_vm0, %v3_v3  }
   0x6   :  { %16 = vrot.lane.b32.xlu0 %v39_v1, %s47_s0 }
  0x74   :  { %v10_v4 = vpop.permute.xlu0 %9  }
  0x75   :  { %12 = vst.msk [vmem:[#allocation0] ss:$8 sm:$0x3] %vm11_vm1, %v10_v4   ;;  %v24_v5 = vpop.permute.xlu1 %23  }
  0x78   :  { %v17_v6 = vpop.permute.xlu0 %16  }
  0x79   :  { %19 = vst.msk [vmem:[#allocation0] ss:$8 sm:$0x3] %vm18_vm2, %v17_v6  }
  0x7a   :  { %26 = vst.msk [vmem:[#allocation0] ss:$8 sm:$0x3] %vm25_vm3, %v24_v5  }
  0x81   :  { %v30_v7 = vld [vmem:[#allocation0] sm:$0x1]  ;;  %v34_v8 = vld [vmem:[#allocation0 + $0x8] sm:$0x1] }
  0x82   :  { %32 = vst [vmem:[%s77_s1] sm:$0x1] %v30_v7  ;;  %41 = vst [vmem:[%s77_s1 + $0x1] sm:$0x1] %v34_v8 }

// kernel: _ffenc_impl.1
= control target key start
LH: loop header
LB: loop body
LE: loop exit
PB: predicated region body
PF: predicated region fallthrough
CT: control target
= control target key end

     0   :  { %v363_v3 = vmov 0.0   ;;  %s598_s1 = inlined_call_operand.vmem [shape: f32[128,256], index: 1, kind: input, shape index: {}]   ;;  %s599_s4 = inlined_call_operand.vmem [shape: f32[256,128], index: 4, kind: input, shape index: {}]   ;;  %s600_s0 = inlined_call_operand.vmem [shape: f32[2,128], index: 0, kind: input, shape index: {}]   ;;  %s601_s2 = inlined_call_operand.vmem [shape: f32[1,256], index: 2, kind: input, shape index: {}]   ;;  %s602_s3 = inlined_call_operand.vmem [shape: f32[1,256], index: 3, kind: input, shape index: {}]   ;;  %s603_s5 = inlined_call_operand.vmem [shape: f32[2,128], index: 5, kind: output, shape index: {}]  }
   0x1   :  { %v22_v0 = vld [vmem:[%s598_s1 + $0x8] sm:$0xff]  ;;  %v24_v1 = vld [vmem:[%s598_s1 + $0x18] sm:$0xff]  ;;  %v21_v2 = vld [vmem:[%s598_s1] sm:$0xff]  ;;  %117 = vmatprep.mubr.f32.mxu0 %v363_v3 }
   0x2   :  { %v298_v4 = vpack.c.bf16 %v24_v1, %v22_v0  ;;  %v23_v5 = vld [vmem:[%s598_s1 + $0x10] sm:$0xff]  ;;  %v26_v6 = vld [vmem:[%s598_s1 + $0x28] sm:$0xff]  ;;  %v28_v7 = vld [vmem:[%s598_s1 + $0x38] sm:$0xff] }
   0x3   :  { %v300_v8 = vpack.c.bf16 %v23_v5, %v21_v2  ;;  %v302_v9 = vpack.c.bf16 %v28_v7, %v26_v6  ;;  %v25_v10 = vld [vmem:[%s598_s1 + $0x20] sm:$0xff]  ;;  %v27_v11 = vld [vmem:[%s598_s1 + $0x30] sm:$0xff]  ;;  %v30_v12 = vld [vmem:[%s598_s1 + $0x48] sm:$0xff] }
   0x4   :  { %299 = vmatprep.subr.bf16.mxu0 %v298_v4  ;;  %v32_v13 = vld [vmem:[%s598_s1 + $0x58] sm:$0xff]  ;;  %v304_v14 = vpack.c.bf16 %v27_v11, %v25_v10  ;;  %v29_v16 = vld [vmem:[%s598_s1 + $0x40] sm:$0xff]  ;;  %v31_v17 = vld [vmem:[%s598_s1 + $0x50] sm:$0xff] }
   0x5   :  { %301 = vmatpush1.bf16.msra.mxu0 %v300_v8  ;;  %v306_v15 = vpack.c.bf16 %v32_v13, %v30_v12  ;;  %v34_v18 = vld [vmem:[%s598_s1 + $0x68] sm:$0xff]  ;;  %v36_v19 = vld [vmem:[%s598_s1 + $0x78] sm:$0xff]  ;;  %v308_v20 = vpack.c.bf16 %v31_v17, %v29_v16  ;;  %v33_v22 = vld [vmem:[%s598_s1 + $0x60] sm:$0xff] }
   0x6   :  { %303 = vmatprep.subr.bf16.mxu0 %v302_v9  ;;  %v310_v21 = vpack.c.bf16 %v36_v19, %v34_v18  ;;  %v35_v23 = vld [vmem:[%s598_s1 + $0x70] sm:$0xff]  ;;  %v38_v24 = vld [vmem:[%s598_s1 + $0x88] sm:$0xff]  ;;  %v40_v25 = vld [vmem:[%s598_s1 + $0x98] sm:$0xff] }
   0x7   :  { %v37_v26 = vld [vmem:[%s598_s1 + $0x80] sm:$0xff]  ;;  %v39_v27 = vld [vmem:[%s598_s1 + $0x90] sm:$0xff]  ;;  %v173_v29 = vld [vmem:[%s599_s4 + $0x88] sm:$0xff]  ;;  %v312_v31 = vpack.c.bf16 %v35_v23, %v33_v22  ;;  %v314_v36 = vpack.c.bf16 %v40_v25, %v38_v24 }
   0x8   :  { %v172_v28 = vld [vmem:[%s599_s4 + $0x80] sm:$0xff]  ;;  %v157_v33 = vld [vmem:[%s599_s4 + $0x8] sm:$0xff]  ;;  %v174_v34 = vld [vmem:[%s599_s4 + $0x90] sm:$0xff]  ;;  %v316_v46 = vpack.c.bf16 %v39_v27, %v37_v26 }
   0x9   :  { %305 = vmatpush1.bf16.msra.mxu0 %v304_v14  ;;  %v156_v30 = vld [vmem:[%s599_s4] sm:$0xff]  ;;  %v330_v32 = vpack.c.bf16 %v173_v29, %v172_v28  ;;  %v175_v35 = vld [vmem:[%s599_s4 + $0x98] sm:$0xff]  ;;  %v158_v39 = vld [vmem:[%s599_s4 + $0x10] sm:$0xff] }
   0xa   :  { %307 = vmatprep.subr.bf16.mxu0 %v306_v15  ;;  %v332_v37 = vpack.c.bf16 %v157_v33, %v156_v30  ;;  %v334_v38 = vpack.c.bf16 %v175_v35, %v174_v34  ;;  %v159_v40 = vld [vmem:[%s599_s4 + $0x18] sm:$0xff]  ;;  %v176_v41 = vld [vmem:[%s599_s4 + $0xa0] sm:$0xff]  ;;  %v42_v42 = vld [vmem:[%s598_s1 + $0xa8] sm:$0xff]  ;;  %v126_v34 = vlaneseq }
   0xb   :  { %v44_v43 = vld [vmem:[%s598_s1 + $0xb8] sm:$0xff]  ;;  %331 = vmatprep.subr.bf16.mxu1 %v330_v32  ;;  %v177_v44 = vld [vmem:[%s599_s4 + $0xa8] sm:$0xff]  ;;  %v336_v45 = vpack.c.bf16 %v159_v40, %v158_v39  ;;  %v41_v47 = vld [vmem:[%s598_s1 + $0xa0] sm:$0xff] }
   0xc   :  { %333 = vmatpush3.bf16.msra.mxu1 %v332_v37  ;;  %v338_v48 = vpack.c.bf16 %v177_v44, %v176_v41  ;;  %v160_v49 = vld [vmem:[%s599_s4 + $0x20] sm:$0xff]  ;;  %v161_v50 = vld [vmem:[%s599_s4 + $0x28] sm:$0xff]  ;;  %v318_v51 = vpack.c.bf16 %v44_v43, %v42_v42  ;;  %v43_v52 = vld [vmem:[%s598_s1 + $0xb0] sm:$0xff]  ;;  %v127_v35 = vshrl.u32 %v126_v34, 7 }
   0xd   :  { %309 = vmatpush1.bf16.msra.mxu0 %v308_v20  ;;  %335 = vmatprep.subr.bf16.mxu1 %v334_v38  ;;  %v178_v53 = vld [vmem:[%s599_s4 + $0xb0] sm:$0xff]  ;;  %v179_v54 = vld [vmem:[%s599_s4 + $0xb8] sm:$0xff]  ;;  %v46_v55 = vld [vmem:[%s598_s1 + $0xc8] sm:$0xff]  ;;  %v340_v57 = vpack.c.bf16 %v161_v50, %v160_v49  ;;  %v320_v58 = vpack.c.bf16 %v43_v52, %v41_v47 }
   0xe   :  { %311 = vmatprep.subr.bf16.mxu0 %v310_v21  ;;  %v48_v56 = vld [vmem:[%s598_s1 + $0xd8] sm:$0xff]  ;;  %v45_v59 = vld [vmem:[%s598_s1 + $0xc0] sm:$0xff]  ;;  %v342_v60 = vpack.c.bf16 %v179_v54, %v178_v53  ;;  %v162_v61 = vld [vmem:[%s599_s4 + $0x30] sm:$0xff]  ;;  %v132_v38 = vsub.s32 1, %v127_v35 }
   0xf   :  { %v163_v62 = vld [vmem:[%s599_s4 + $0x38] sm:$0xff]  ;;  %v322_v63 = vpack.c.bf16 %v48_v56, %v46_v55  ;;  %v47_v0 = vld [vmem:[%s598_s1 + $0xd0] sm:$0xff]  ;;  %v180_v1 = vld [vmem:[%s599_s4 + $0xc0] sm:$0xff] }
  0x10   :  { %337 = vmatpush3.bf16.msra.mxu1 %v336_v45  ;;  %v181_v2 = vld [vmem:[%s599_s4 + $0xc8] sm:$0xff]  ;;  %v52_v4 = vld [vmem:[%s598_s1 + $0xf8] sm:$0xff]  ;;  %v344_v5 = vpack.c.bf16 %v163_v62, %v162_v61  ;;  %v324_v6 = vpack.c.bf16 %v47_v0, %v45_v59  ;;  %v49_v7 = vld [vmem:[%s598_s1 + $0xe0] sm:$0xff] }
  0x11   :  { %313 = vmatpush1.bf16.msra.mxu0 %v312_v31  ;;  %339 = vmatprep.subr.bf16.mxu1 %v338_v48  ;;  %v50_v3 = vld [vmem:[%s598_s1 + $0xe8] sm:$0xff]  ;;  %v346_v8 = vpack.c.bf16 %v181_v2, %v180_v1  ;;  %v164_v9 = vld [vmem:[%s599_s4 + $0x40] sm:$0xff]  ;;  %v51_v12 = vld [vmem:[%s598_s1 + $0xf0] sm:$0xff] }
  0x12   :  { %315 = vmatprep.subr.bf16.mxu0 %v314_v36  ;;  %v165_v10 = vld [vmem:[%s599_s4 + $0x48] sm:$0xff]  ;;  %v326_v11 = vpack.c.bf16 %v52_v4, %v50_v3  ;;  %v182_v13 = vld [vmem:[%s599_s4 + $0xd0] sm:$0xff]  ;;  %v183_v14 = vld [vmem:[%s599_s4 + $0xd8] sm:$0xff]  ;;  %v328_v16 = vpack.c.bf16 %v51_v12, %v49_v7  ;;  %v128_v36 = vsub.s32 0, %v127_v35 }
  0x13   :  { %v348_v15 = vpack.c.bf16 %v165_v10, %v164_v9  ;;  %v350_v17 = vpack.c.bf16 %v183_v14, %v182_v13  ;;  %v20_v18 = vld [vmem:[%s600_s0] sm:$0x3]  ;;  %v166_v19 = vld [vmem:[%s599_s4 + $0x50] sm:$0xff]  ;;  %v167_v20 = vld [vmem:[%s599_s4 + $0x58] sm:$0xff] }
  0x14   :  { %341 = vmatpush3.bf16.msra.mxu1 %v340_v57  ;;  %v352_v21 = vpack.c.bf16 %v167_v20, %v166_v19  ;;  %v184_v22 = vld [vmem:[%s599_s4 + $0xe0] sm:$0xff]  ;;  %v185_v23 = vld [vmem:[%s599_s4 + $0xe8] sm:$0xff]  ;;  %v186_v28 = vld [vmem:[%s599_s4 + $0xf0] sm:$0xff] }
  0x15   :  { %317 = vmatpush1.bf16.msra.mxu0 %v316_v46  ;;  %343 = vmatprep.subr.bf16.mxu1 %v342_v60  ;;  %v354_v24 = vpack.c.bf16 %v185_v23, %v184_v22  ;;  %v168_v25 = vld [vmem:[%s599_s4 + $0x60] sm:$0xff]  ;;  %v169_v26 = vld [vmem:[%s599_s4 + $0x68] sm:$0xff]  ;;  %v187_v29 = vld [vmem:[%s599_s4 + $0xf8] sm:$0xff] }
  0x16   :  { %319 = vmatprep.subr.bf16.mxu0 %v318_v51  ;;  %v356_v27 = vpack.c.bf16 %v169_v26, %v168_v25  ;;  %v358_v30 = vpack.c.bf16 %v187_v29, %v186_v28  ;;  %v170_v31 = vld [vmem:[%s599_s4 + $0x70] sm:$0xff]  ;;  %v171_v32 = vld [vmem:[%s599_s4 + $0x78] sm:$0xff]  ;;  %v124_v37 = vld [vmem:[%s601_s2] sm:$0x3] }
  0x17   :  { %v360_v33 = vpack.c.bf16 %v171_v32, %v170_v31  ;;  %v138_v39 = vld [vmem:[%s602_s3] sm:$0x3]  ;;  %v129_v40 = vrot.slane %v124_v37, %v128_v36  ;;  %v133_v41 = vrot.slane %v124_v37, %v132_v38 }
  0x18   :  { %345 = vmatpush3.bf16.msra.mxu1 %v344_v5  ;;  %v143_v42 = vrot.slane %v138_v39, %v128_v36  ;;  %v147_v44 = vrot.slane %v138_v39, %v132_v38 }
  0x19   :  { %321 = vmatpush1.bf16.msra.mxu0 %v320_v58  ;;  %347 = vmatprep.subr.bf16.mxu1 %v346_v8 }
  0x1a   :  { %323 = vmatprep.subr.bf16.mxu0 %v322_v63 }
  0x1c   :  { %349 = vmatpush3.bf16.msra.mxu1 %v348_v15 }
  0x1d   :  { %325 = vmatpush1.bf16.msra.mxu0 %v324_v6  ;;  %351 = vmatprep.subr.bf16.mxu1 %v350_v17 }
  0x1e   :  { %327 = vmatprep.subr.bf16.mxu0 %v326_v11 }
  0x20   :  { %353 = vmatpush3.bf16.msra.mxu1 %v352_v21 }
  0x21   :  { %329 = vmatpush1.bf16.msra.mxu0 %v328_v16  ;;  %355 = vmatprep.subr.bf16.mxu1 %v354_v24 }
  0x24   :  { %118 = vmatmul.mubr.f32.vlgmr.msra.gmra.mrb[0].mxu0 %v20_v18  ;;  %357 = vmatpush3.bf16.msra.mxu1 %v356_v27 }
  0x25   :  { %359 = vmatprep.subr.bf16.mxu1 %v358_v30 }
  0x28   :  { %361 = vmatpush3.bf16.msra.mxu1 %v360_v33 }
  0xf7   :  { %v119_v43 = vpop.f32.mrb[0].mxu0 }
  0xf8   :  { %v136_v45 = vmul.f32 %v129_v40, %v119_v43  ;;  %v121_v46 = vpop.f32.mrb[1].mxu0 }
  0xf9   :  { %v137_v47 = vmul.f32 %v133_v41, %v121_v46 }
  0xfa   :  { %v150_v48 = vadd.f32 %v143_v42, %v136_v45 }
  0xfb   :  { %v151_v49 = vadd.f32 %v147_v44, %v137_v47 }
  0xfc   :  { %v152_v50 = vmul.f32 0.2, %v150_v48 }
  0xfd   :  { %v153_v51 = vmul.f32 0.2, %v151_v49 }
  0xfe   :  { %v154_v53 = vmax.f32 %v150_v48, %v152_v50 }
  0xff   :  { %v155_v52 = vmax.f32 %v151_v49, %v153_v51 }
 0x101   :  { %252 = vmatprep.mubr.f32.mxu1 %v155_v52 }
 0x102   :  { %253 = vmatmul.mubr.f32.vlgmr.msra.gmra.mrb[0].mxu1 %v154_v53 }
 0x1d5   :  { %v295_v54 = vpop.f32.mrb[0].mxu1 }
 0x1d6   :  { %v296_v55 = vpop.f32.mrb[1].mxu1 }
 0x1d7   :  { %v297_v56 = vadd.f32 %v296_v55, %v295_v54 }
 0x1d9   :  { %258 = vst [vmem:[%s603_s5] sm:$0x3] %v297_v56 }

</bundles_post_ra>
